<compile_context>
chip_gen: v5e
topology: v5e:2x2
jax: 0.10.0
libtpu: 0.0.40
codegen_flags: <defaults>
</compile_context>

<pallas_src>
import jax
import jax.numpy as jnp
from jax.experimental import pallas as pl
from jax.experimental.pallas import tpu as pltpu


def _round_up(x, m):
    return ((x + m - 1) // m) * m


def _critic_kernel(xt_ref, w1_ref, b1_ref, w2_ref, b2_ref, w3_ref, b3_ref,
                   q_ref):
    f32 = jnp.float32
    mxu_dtype = w1_ref.dtype  # bf16 by default (f32 on the exact path)

    # Layer 1: [64, S+A] @ [S+A, TB] -> [64, TB]   (batch on lanes)
    h1 = jnp.dot(w1_ref[...], xt_ref[...], preferred_element_type=f32)
    h1 = jnp.maximum(h1 + b1_ref[...], 0.0)                       # f32 bias+ReLU

    # Layer 2: [32, 64] @ [64, TB] -> [32, TB]
    h2 = jnp.dot(w2_ref[...], h1.astype(mxu_dtype), preferred_element_type=f32)
    h2 = jnp.maximum(h2 + b2_ref[...], 0.0)

    # Layer 3: [1, 32] @ [32, TB] -> [1, TB]   (lane-dense output, no transpose)
    q = jnp.dot(w3_ref[...], h2.astype(mxu_dtype), preferred_element_type=f32)
    q_ref[...] = (q + b3_ref[...]).astype(q_ref.dtype)


def critic_forward(state, action, params, *, block_rows=2048,
                   compute_dtype=jnp.bfloat16):
    """state: [B, S], action: [B, A]; params in PyTorch layout -> q: [B, 1] f32."""
    assert block_rows % 128 == 0
    w1, b1, w2, b2, w3, b3 = params          # w1:[64,S+A] b1:[64] w2:[32,64] ...
    B, S = state.shape
    A = action.shape[1]
    SA = S + A
    assert w1.shape == (64, SA)

    # Batch tile: multiple of 128 (lane-dense), >=2 grid steps when B > 128 so
    # both v7x TensorCores get work; capped by block_rows to bound VMEM.
    tb = min(block_rows, _round_up(pl.cdiv(max(B, 1), 2), 128))
    Bp = _round_up(max(B, 1), tb)
    n_tiles = Bp // tb

    # Feature-major input [S+A, Bp]: concat + cast + transpose + pad fuse into a
    # single cheap XLA producer (no extra HBM round-trip beyond the input itself).
    xt = jnp.concatenate([state, action], axis=1).astype(compute_dtype).T
    if Bp != B:
        xt = jnp.pad(xt, ((0, 0), (0, Bp - B)))

    w1c = w1.astype(compute_dtype)
    w2c = w2.astype(compute_dtype)
    w3c = w3.astype(compute_dtype)
    b1c = b1.reshape(64, 1).astype(jnp.float32)   # column biases: broadcast over lanes
    b2c = b2.reshape(32, 1).astype(jnp.float32)
    b3c = b3.reshape(1, 1).astype(jnp.float32)

    weight_bytes = sum(int(x.size) * jnp.dtype(x.dtype).itemsize
                       for x in (w1c, b1c, w2c, b2c, w3c, b3c))
    cost = pl.CostEstimate(
        flops=2 * Bp * (SA * 64 + 64 * 32 + 32 * 1) + Bp * (64 + 32 + 1),
        transcendentals=0,
        bytes_accessed=(Bp * SA * jnp.dtype(compute_dtype).itemsize
                        + Bp * 4 + weight_bytes),
    )

    const = lambda i: (0, 0)   # weights/biases: same block every step -> VMEM-resident
    q_row = pl.pallas_call(
        _critic_kernel,
        out_shape=jax.ShapeDtypeStruct((1, Bp), jnp.float32),
        grid=(n_tiles,),
        in_specs=[
            pl.BlockSpec((SA, tb), lambda i: (0, i)),   # x^T tile (streamed)
            pl.BlockSpec((64, SA), const),              # W1
            pl.BlockSpec((64, 1), const),               # b1
            pl.BlockSpec((32, 64), const),              # W2
            pl.BlockSpec((32, 1), const),               # b2
            pl.BlockSpec((1, 32), const),               # W3
            pl.BlockSpec((1, 1), const),                # b3
        ],
        out_specs=pl.BlockSpec((1, tb), lambda i: (0, i)),
        compiler_params=pltpu.CompilerParams(
            dimension_semantics=("parallel",),
            vmem_limit_bytes=32 * 1024 * 1024,
        ),
        cost_estimate=cost,
    )(xt, w1c, b1c, w2c, b2c, w3c, b3c)

    return q_row[0, :B].reshape(B, 1)


def init_critic_params(key, state_dim, action_dim):
    """Mirrors the PyTorch init (weights ~ N(0, 0.1), biases = 0.1), PyTorch
       [out, in] weight layout — which is exactly the feature-major layout the
       kernel wants."""
    k1, k2, k3 = jax.random.split(key, 3)
    w1 = 0.1 * jax.random.normal(k1, (64, state_dim + action_dim), dtype=jnp.float32)
    b1 = jnp.full((64,), 0.1, dtype=jnp.float32)
    w2 = 0.1 * jax.random.normal(k2, (32, 64), dtype=jnp.float32)
    b2 = jnp.full((32,), 0.1, dtype=jnp.float32)
    w3 = 0.1 * jax.random.normal(k3, (1, 32), dtype=jnp.float32)
    b3 = jnp.full((1,), 0.1, dtype=jnp.float32)
    return (w1, b1, w2, b2, w3, b3)


def _reference_forward(state, action, params):
    w1, b1, w2, b2, w3, b3 = params
    sa = jnp.concatenate([state, action], axis=1)
    h1 = jnp.maximum(sa @ w1.T + b1, 0.0)
    h2 = jnp.maximum(h1 @ w2.T + b2, 0.0)
    return h2 @ w3.T + b3


if __name__ == "__main__":
    key = jax.random.PRNGKey(0)
    kp, ks, ka, ks2, ka2 = jax.random.split(key, 5)
    state_dim, action_dim = 12, 4
    params = init_critic_params(kp, state_dim, action_dim)

    # Small inference-style batch.
    B = 8
    state = jax.random.normal(ks, (B, state_dim), dtype=jnp.float32)
    action = jax.random.normal(ka, (B, action_dim), dtype=jnp.float32)
    q_ref = _reference_forward(state, action, params)

    # Exact f32-MXU path.
    q_f32 = jax.block_until_ready(
        critic_forward(state, action, params, compute_dtype=jnp.float32))
    assert q_f32.shape == (B, 1)
    assert jnp.allclose(q_f32, q_ref, atol=1e-3, rtol=1e-3)

    # Default bf16-MXU path (f32 accumulation / bias / ReLU).
    q_bf16 = jax.block_until_ready(critic_forward(state, action, params))
    assert q_bf16.shape == (B, 1)
    assert jnp.allclose(q_bf16, q_ref, atol=5e-2, rtol=5e-2)

    # Larger, non-aligned batch exercising padding + the multi-tile parallel grid
    # (tb=256 -> 2 grid steps -> both v7x TensorCores busy).
    B2 = 300
    state2 = jax.random.normal(ks2, (B2, state_dim), dtype=jnp.float32)
    action2 = jax.random.normal(ka2, (B2, action_dim), dtype=jnp.float32)
    q2_ref = _reference_forward(state2, action2, params)
    q2 = jax.block_until_ready(critic_forward(state2, action2, params))
    assert q2.shape == (B2, 1)
    assert jnp.allclose(q2, q2_ref, atol=5e-2, rtol=5e-2)

    print("KERNEL_OK")
</pallas_src>

<mosaic_0001>
module attributes {stable_mosaic.version = 11 : i64} {
  func.func @_critic_kernel(%arg0: i32, %arg1: memref<16x128xf32, #tpu.memory_space<vmem>>, %arg2: memref<64x16xf32, #tpu.memory_space<vmem>>, %arg3: memref<64x1xf32, #tpu.memory_space<vmem>>, %arg4: memref<32x64xf32, #tpu.memory_space<vmem>>, %arg5: memref<32x1xf32, #tpu.memory_space<vmem>>, %arg6: memref<1x32xf32, #tpu.memory_space<vmem>>, %arg7: memref<1x1xf32, #tpu.memory_space<vmem>>, %arg8: memref<1x128xf32, #tpu.memory_space<vmem>>) attributes {dimension_semantics = [#tpu.dimension_semantics<parallel>], iteration_bounds = array<i64: 1>, scalar_prefetch = 0 : i64, scratch_operands = 0 : i64, tpu.core_type = #tpu.core_type<tc>, window_params = [{transform_indices = @transform_0, window_bounds = array<i64: 16, 128>}, {pipeline_mode = #tpu.pipeline_mode<synchronous>, transform_indices = @transform_1, window_bounds = array<i64: 64, 16>}, {pipeline_mode = #tpu.pipeline_mode<synchronous>, transform_indices = @transform_2, window_bounds = array<i64: 64, 1>}, {pipeline_mode = #tpu.pipeline_mode<synchronous>, transform_indices = @transform_3, window_bounds = array<i64: 32, 64>}, {pipeline_mode = #tpu.pipeline_mode<synchronous>, transform_indices = @transform_4, window_bounds = array<i64: 32, 1>}, {pipeline_mode = #tpu.pipeline_mode<synchronous>, transform_indices = @transform_5, window_bounds = array<i64: 1, 32>}, {pipeline_mode = #tpu.pipeline_mode<synchronous>, transform_indices = @transform_6, window_bounds = array<i64: 1, 1>}, {transform_indices = @transform_7, window_bounds = array<i64: 1, 128>}]} {
    %c0 = arith.constant 0 : index
    %c0_0 = arith.constant 0 : index
    %0 = vector.load %arg2[%c0, %c0_0] : memref<64x16xf32, #tpu.memory_space<vmem>>, vector<64x16xf32>
    %c0_1 = arith.constant 0 : index
    %c0_2 = arith.constant 0 : index
    %1 = vector.load %arg1[%c0_1, %c0_2] : memref<16x128xf32, #tpu.memory_space<vmem>>, vector<16x128xf32>
    %cst = arith.constant dense<0.000000e+00> : vector<64x128xf32>
    %2 = tpu.matmul %0, %1, %cst {dimension_numbers = #tpu.dot_dimension_numbers<[1], [0], [0], [1], [0, 0, 1, 1], [], []>} : vector<64x16xf32>, vector<16x128xf32>, vector<64x128xf32> -> vector<64x128xf32>
    %c0_3 = arith.constant 0 : index
    %c0_4 = arith.constant 0 : index
    %3 = vector.load %arg3[%c0_3, %c0_4] : memref<64x1xf32, #tpu.memory_space<vmem>>, vector<64x1xf32>
    %4 = vector.broadcast %3 : vector<64x1xf32> to vector<64x128xf32>
    %5 = arith.addf %2, %4 : vector<64x128xf32>
    %cst_5 = arith.constant 0.000000e+00 : f32
    %6 = vector.broadcast %cst_5 : f32 to vector<64x128xf32>
    %7 = arith.maximumf %5, %6 : vector<64x128xf32>
    %c0_6 = arith.constant 0 : index
    %c0_7 = arith.constant 0 : index
    %8 = vector.load %arg4[%c0_6, %c0_7] : memref<32x64xf32, #tpu.memory_space<vmem>>, vector<32x64xf32>
    %cst_8 = arith.constant dense<0.000000e+00> : vector<32x128xf32>
    %9 = tpu.matmul %8, %7, %cst_8 {dimension_numbers = #tpu.dot_dimension_numbers<[1], [0], [0], [1], [0, 0, 1, 1], [], []>} : vector<32x64xf32>, vector<64x128xf32>, vector<32x128xf32> -> vector<32x128xf32>
    %c0_9 = arith.constant 0 : index
    %c0_10 = arith.constant 0 : index
    %10 = vector.load %arg5[%c0_9, %c0_10] : memref<32x1xf32, #tpu.memory_space<vmem>>, vector<32x1xf32>
    %11 = vector.broadcast %10 : vector<32x1xf32> to vector<32x128xf32>
    %12 = arith.addf %9, %11 : vector<32x128xf32>
    %cst_11 = arith.constant 0.000000e+00 : f32
    %13 = vector.broadcast %cst_11 : f32 to vector<32x128xf32>
    %14 = arith.maximumf %12, %13 : vector<32x128xf32>
    %c0_12 = arith.constant 0 : index
    %c0_13 = arith.constant 0 : index
    %15 = vector.load %arg6[%c0_12, %c0_13] : memref<1x32xf32, #tpu.memory_space<vmem>>, vector<1x32xf32>
    %cst_14 = arith.constant dense<0.000000e+00> : vector<1x128xf32>
    %16 = tpu.matmul %15, %14, %cst_14 {dimension_numbers = #tpu.dot_dimension_numbers<[1], [0], [0], [1], [0, 0, 1, 1], [], []>} : vector<1x32xf32>, vector<32x128xf32>, vector<1x128xf32> -> vector<1x128xf32>
    %c0_15 = arith.constant 0 : index
    %c0_16 = arith.constant 0 : index
    %17 = vector.load %arg7[%c0_15, %c0_16] : memref<1x1xf32, #tpu.memory_space<vmem>>, vector<1x1xf32>
    %18 = vector.broadcast %17 : vector<1x1xf32> to vector<1x128xf32>
    %19 = arith.addf %16, %18 : vector<1x128xf32>
    %c0_17 = arith.constant 0 : index
    %c0_18 = arith.constant 0 : index
    %20 = vector.load %arg8[%c0_17, %c0_18] : memref<1x128xf32, #tpu.memory_space<vmem>>, vector<1x128xf32>
    tpu.vector_store %arg8[%c0_17, %c0_18], %19 {strides = array<i32>} : memref<1x128xf32, #tpu.memory_space<vmem>>, vector<1x128xf32>,
    return
  }
  func.func @transform_0(%arg0: i32) -> (i32, i32) {
    %c0_i32 = arith.constant 0 : i32
    %c0_i32_0 = arith.constant 0 : i32
    return %c0_i32, %arg0 : i32, i32
  }
  func.func @transform_1(%arg0: i32) -> (i32, i32) {
    %c0_i32 = arith.constant 0 : i32
    %c0_i32_0 = arith.constant 0 : i32
    %c0_i32_1 = arith.constant 0 : i32
    return %c0_i32, %c0_i32_0 : i32, i32
  }
  func.func @transform_2(%arg0: i32) -> (i32, i32) {
    %c0_i32 = arith.constant 0 : i32
    %c0_i32_0 = arith.constant 0 : i32
    %c0_i32_1 = arith.constant 0 : i32
    return %c0_i32, %c0_i32_0 : i32, i32
  }
  func.func @transform_3(%arg0: i32) -> (i32, i32) {
    %c0_i32 = arith.constant 0 : i32
    %c0_i32_0 = arith.constant 0 : i32
    %c0_i32_1 = arith.constant 0 : i32
    return %c0_i32, %c0_i32_0 : i32, i32
  }
  func.func @transform_4(%arg0: i32) -> (i32, i32) {
    %c0_i32 = arith.constant 0 : i32
    %c0_i32_0 = arith.constant 0 : i32
    %c0_i32_1 = arith.constant 0 : i32
    return %c0_i32, %c0_i32_0 : i32, i32
  }
  func.func @transform_5(%arg0: i32) -> (i32, i32) {
    %c0_i32 = arith.constant 0 : i32
    %c0_i32_0 = arith.constant 0 : i32
    %c0_i32_1 = arith.constant 0 : i32
    return %c0_i32, %c0_i32_0 : i32, i32
  }
  func.func @transform_6(%arg0: i32) -> (i32, i32) {
    %c0_i32 = arith.constant 0 : i32
    %c0_i32_0 = arith.constant 0 : i32
    %c0_i32_1 = arith.constant 0 : i32
    return %c0_i32, %c0_i32_0 : i32, i32
  }
  func.func @transform_7(%arg0: i32) -> (i32, i32) {
    %c0_i32 = arith.constant 0 : i32
    %c0_i32_0 = arith.constant 0 : i32
    return %c0_i32, %arg0 : i32, i32
  }
}

</mosaic_0001>

<bundles_post_ra>
// kernel: tpu_custom_call.1
= control target key start
LH: loop header
LB: loop body
LE: loop exit
PB: predicated region body
PF: predicated region fallthrough
CT: control target
= control target key end

     0   :  { %s475_s0 = inlined_call_operand.vmem [shape: f32[16,128], index: 0, kind: input, shape index: {}]   ;;  %s476_s1 = inlined_call_operand.vmem [shape: f32[64,16], index: 1, kind: input, shape index: {}]   ;;  %s477_s2 = inlined_call_operand.vmem [shape: f32[64,1], index: 2, kind: input, shape index: {}]   ;;  %s478_s3 = inlined_call_operand.vmem [shape: f32[32,64], index: 3, kind: input, shape index: {}]   ;;  %s479_s4 = inlined_call_operand.vmem [shape: f32[32,1], index: 4, kind: input, shape index: {}]   ;;  %s480_s5 = inlined_call_operand.vmem [shape: f32[1,32], index: 5, kind: input, shape index: {}]   ;;  %s481_s6 = inlined_call_operand.<no memory space> [shape: f32[1,1], index: 6, kind: input, shape index: {}]   ;;  %s482_s7 = inlined_call_operand.hbm [shape: f32[1,128], index: 7, kind: output, shape index: {}]  }
   0x1   :  { %v12_v0 = vstv %s481_s6 }
   0x2   :  { %13 = vst [vmem:[#allocation2] sm:$0x1] %v12_v0 }
   0x3   :  { %v38_v1 = vld [vmem:[%s475_s0 + $0x8] sm:$0xff]  ;;  %v37_v2 = vld [vmem:[%s475_s0] sm:$0xff]  ;;  %vm87_vm0 = vcmask 130048   ;;  %v338_v4 = vmov 0   ;;  %v46_v5 = vld [vmem:[%s477_s2 + $0x38] sm:$0xff] }
   0x4   :  { %297 = vmatpush.msra.mxu3 %v38_v1  ;;  %v33_v3 = vld [vmem:[%s476_s1 + $0x20] sm:$0xff]  ;;  %309 = vset.pattern.permute.xlu0 %v338_v4  ;;  %v44_v7 = vld [vmem:[%s477_s2 + $0x28] sm:$0xff]  ;;  %v42_v8 = vld [vmem:[%s477_s2 + $0x18] sm:$0xff] }
   0x5   :  { %84 = vperm.xlu0 %309, %v46_v5   ;;  %126 = vmatpush.msra.mxu0 %v38_v1  ;;  %v29_v6 = vld [vmem:[%s476_s1] sm:$0xff]  ;;  %v45_v9 = vld [vmem:[%s477_s2 + $0x30] sm:$0xff] }
   0x6   :  { %298 = vmatpush.msra.mxu3 %v37_v2  ;;  %310 = vset.pattern.permute.xlu1 %v338_v4 }
   0x7   :  { %288 = vmatmul.msk.f32.vlgmr.msra.gmra.mxu3 %vm87_vm0, %v33_v3  ;;  %127 = vmatpush.msra.mxu0 %v37_v2 }
   0x8   :  { %284 = vmatmul.msk.f32.vlgmr.msra.gmra.mxu0 %vm87_vm0, %v29_v6  ;;  %74 = vperm.xlu1 %310, %v44_v7  }
   0x9   :  { %311 = vset.pattern.permute.xlu2 %v338_v4 }
   0xa   :  { %64 = vperm.xlu2 %311, %v42_v8  }
   0xb   :  { %14 = vsyncpa [#allocation4], 0  ;;  %v34_v10 = vld [vmem:[%s476_s1 + $0x28] sm:$0xff]  ;;  %v43_v12 = vld [vmem:[%s477_s2 + $0x20] sm:$0xff]  ;;  %vm189_vm1 = vcmask 523264   ;;  %vm243_vm2 = vcmask 261120  }
   0xc   :  { %v30_v11 = vld [vmem:[%s476_s1 + $0x8] sm:$0xff]  ;;  %v41_v13 = vld [vmem:[%s477_s2 + $0x10] sm:$0xff]  ;;  %v39_v17 = vld [vmem:[%s477_s2] sm:$0xff]  ;;  %s339_s26 = smov [#allocation3]   ;;  %s275_s30 = sshll.u32 %s482_s7, 4  ;;  %s276_s30 = int_to_ptr.hbm [resolvable:$true] %s275_s30 }
   0xd   :  { %79 = vperm.xlu0 %309, %v45_v9   ;;  %v40_v14 = vld [vmem:[%s477_s2 + $0x8] sm:$0xff]  ;;  %v35_v15 = vld [vmem:[%s476_s1 + $0x30] sm:$0xff]  ;;  %v168_v18 = vld [vmem:[%s479_s4 + $0x18] sm:$0xff]  ;;  %s273_s27 = sshll.u32 %s339_s26, 4  ;;  %s274_s27 = int_to_ptr.vmem [resolvable:$true] %s273_s27 }
   0xe   :  { %v31_v16 = vld [vmem:[%s476_s1 + $0x10] sm:$0xff]  ;;  %v36_v20 = vld [vmem:[%s476_s1 + $0x38] sm:$0xff]  ;;  %v166_v22 = vld [vmem:[%s479_s4 + $0x8] sm:$0xff] }
   0xf   :  { %289 = vmatmul.msk.f32.gmra.mxu3 %vm87_vm0, %v34_v10  ;;  %v167_v19 = vld [vmem:[%s479_s4 + $0x10] sm:$0xff]  ;;  %v32_v21 = vld [vmem:[%s476_s1 + $0x18] sm:$0xff]  ;;  %v165_v23 = vld [vmem:[%s479_s4] sm:$0xff] }
  0x10   :  { %285 = vmatmul.msk.f32.gmra.mxu0 %vm87_vm0, %v30_v11  ;;  %69 = vperm.xlu1 %310, %v43_v12   ;;  %v236_v24 = vld [vmem:[#allocation2] sm:$0x1]  ;;  %v164_v58 = vld [vmem:[%s478_s3 + $0x18] sm:$0xff]  ;;  %v162_v59 = vld [vmem:[%s478_s3 + $0x8] sm:$0xff] }
  0x11   :  { %v161_v57 = vld [vmem:[%s478_s3] sm:$0xff]  ;;  %v163_v60 = vld [vmem:[%s478_s3 + $0x10] sm:$0xff] }
  0x12   :  { %59 = vperm.xlu2 %311, %v41_v13   ;;  %v235_v13 = vld [vmem:[%s480_s5] sm:$0x1] }
  0x15   :  { %54 = vperm.xlu0 %309, %v40_v14  }
  0x17   :  { %290 = vmatmul.msk.f32.gmra.mxu3 %vm87_vm0, %v35_v15 }
  0x18   :  { %286 = vmatmul.msk.f32.gmra.mxu0 %vm87_vm0, %v31_v16  ;;  %49 = vperm.xlu1 %310, %v39_v17  }
  0x1a   :  { %186 = vperm.xlu2 %311, %v168_v18  }
  0x1d   :  { %181 = vperm.xlu0 %309, %v167_v19  }
  0x1f   :  { %291 = vmatmul.msk.f32.gmra.mxu3 %vm87_vm0, %v36_v20 }
  0x20   :  { %287 = vmatmul.msk.f32.gmra.mxu0 %vm87_vm0, %v32_v21  ;;  %176 = vperm.xlu1 %310, %v166_v22  }
  0x22   :  { %171 = vperm.xlu2 %311, %v165_v23  }
  0x25   :  { %239 = vperm.xlu0 %309, %v236_v24  }
  0x64   :  { %v65_v33 = vpop.permute.xlu2 %64 }
  0x6c   :  { %v60_v46 = vpop.permute.xlu2 %59 }
  0x74   :  { %v187_v62 = vpop.permute.xlu2 %186 }
  0x77   :  { %v85_v29 = vpop.permute.xlu0 %84 }
  0x7a   :  { %v75_v30 = vpop.permute.xlu1 %74 }
  0x7c   :  { %v172_v8 = vpop.permute.xlu2 %171 }
  0x7f   :  { %v80_v34 = vpop.permute.xlu0 %79 }
  0x82   :  { %v70_v35 = vpop.permute.xlu1 %69 }
  0x85   :  { %v129_v25 = vpop.f32.mrf.mxu0 }
  0x87   :  { %v55_v49 = vpop.permute.xlu0 %54 }
  0x8a   :  { %v141_v26 = vpop.f32.mrf.mxu3  ;;  %v50_v50 = vpop.permute.xlu1 %49 }
  0x8b   :  { %v142_v42 = vadd.f32 %v141_v26, %v70_v35  ;;  %v130_v53 = vadd.f32 %v129_v25, %v50_v50 }
  0x8d   :  { %v132_v28 = vpop.f32.mrf.mxu0  ;;  %v157_v47 = vmax.f32 %v142_v42, 0.0  ;;  %v153_v56 = vmax.f32 %v130_v53, 0.0 }
  0x8e   :  { %v133_v51 = vadd.f32 %v132_v28, %v55_v49 }
  0x8f   :  { %v182_v3 = vpop.permute.xlu0 %181 }
  0x90   :  { %v154_v55 = vmax.f32 %v133_v51, 0.0 }
  0x92   :  { %v144_v27 = vpop.f32.mrf.mxu3  ;;  %v177_v4 = vpop.permute.xlu1 %176 }
  0x93   :  { %v145_v39 = vadd.f32 %v144_v27, %v75_v30 }
  0x95   :  { %v135_v32 = vpop.f32.mrf.mxu0  ;;  %v158_v44 = vmax.f32 %v145_v39, 0.0 }
  0x96   :  { %v136_v48 = vadd.f32 %v135_v32, %v60_v46 }
  0x97   :  { %v240_v14 = vpop.permute.xlu0 %239 }
  0x98   :  { %v155_v54 = vmax.f32 %v136_v48, 0.0  ;;  %v242_v15 = vperm.slane %v240_v14, 0 }
  0x9a   :  { %v147_v31 = vpop.f32.mrf.mxu3 }
  0x9b   :  { %v148_v37 = vadd.f32 %v147_v31, %v80_v34 }
  0x9d   :  { %v138_v41 = vpop.f32.mrf.mxu0  ;;  %v159_v43 = vmax.f32 %v148_v37, 0.0 }
  0x9e   :  { %v139_v45 = vadd.f32 %v138_v41, %v65_v33 }
  0xa0   :  { %v156_v52 = vmax.f32 %v139_v45, 0.0 }
  0xa2   :  { %v150_v36 = vpop.f32.mrf.mxu3 }
  0xa3   :  { %v151_v38 = vadd.f32 %v150_v36, %v85_v29 }
  0xa5   :  { %v160_v40 = vmax.f32 %v151_v38, 0.0 }
  0xa7   :  { %210 = vmatpush.msra.mxu1 %v160_v40  ;;  %299 = vmatpush.msra.mxu2 %v160_v40 }
  0xa9   :  { %211 = vmatpush.msra.mxu1 %v159_v43  ;;  %300 = vmatpush.msra.mxu2 %v159_v43 }
  0xab   :  { %212 = vmatpush.msra.mxu1 %v158_v44  ;;  %301 = vmatpush.msra.mxu2 %v158_v44 }
  0xad   :  { %213 = vmatpush.msra.mxu1 %v157_v47  ;;  %302 = vmatpush.msra.mxu2 %v157_v47 }
  0xaf   :  { %214 = vmatpush.msra.mxu1 %v156_v52  ;;  %303 = vmatpush.msra.mxu2 %v156_v52 }
  0xb1   :  { %215 = vmatpush.msra.mxu1 %v155_v54  ;;  %304 = vmatpush.msra.mxu2 %v155_v54 }
  0xb3   :  { %216 = vmatpush.msra.mxu1 %v154_v55  ;;  %305 = vmatpush.msra.mxu2 %v154_v55 }
  0xb5   :  { %217 = vmatpush.msra.mxu1 %v153_v56  ;;  %306 = vmatpush.msra.mxu2 %v153_v56 }
  0xb6   :  { %292 = vmatmul.msk.f32.vlgmr.msra.gmra.mxu1 %vm189_vm1, %v161_v57  ;;  %295 = vmatmul.msk.f32.vlgmr.msra.gmra.mxu2 %vm189_vm1, %v164_v58 }
  0xbe   :  { %293 = vmatmul.msk.f32.gmra.mxu1 %vm189_vm1, %v162_v59 }
  0xc6   :  { %294 = vmatmul.msk.f32.gmra.mxu1 %vm189_vm1, %v163_v60 }
 0x133   :  { %v219_v61 = vpop.f32.mrf.mxu1 }
 0x134   :  { %v220_v9 = vadd.f32 %v219_v61, %v172_v8 }
 0x136   :  { %v231_v12 = vmax.f32 %v220_v9, 0.0 }
 0x139   :  { %v228_v63 = vpop.f32.mrf.mxu2 }
 0x13a   :  { %v229_v0 = vadd.f32 %v228_v63, %v187_v62 }
 0x13b   :  { %v222_v1 = vpop.f32.mrf.mxu1 }
 0x13c   :  { %v234_v2 = vmax.f32 %v229_v0, 0.0  ;;  %v223_v6 = vadd.f32 %v222_v1, %v177_v4 }
 0x13e   :  { %259 = vmatpush.msrb.mxu2 %v234_v2  ;;  %v232_v11 = vmax.f32 %v223_v6, 0.0 }
 0x143   :  { %v225_v5 = vpop.f32.mrf.mxu1 }
 0x144   :  { %v226_v7 = vadd.f32 %v225_v5, %v182_v3 }
 0x146   :  { %v233_v10 = vmax.f32 %v226_v7, 0.0 }
 0x148   :  { %260 = vmatpush.msrb.mxu2 %v233_v10 }
 0x14a   :  { %261 = vmatpush.msrb.mxu2 %v232_v11 }
 0x14c   :  { %262 = vmatpush.msrb.mxu2 %v231_v12 }
 0x14d   :  { %296 = vmatmul.msk.f32.vlgmr.msrb.gmra.mxu2 %vm243_vm2, %v235_v13 }
 0x1d0   :  { %v264_v16 = vpop.f32.mrf.mxu2 }
 0x1d1   :  { %v265_v17 = vadd.f32 %v264_v16, %v242_v15 }
 0x1d3   :  { %267 = vst [vmem:[#allocation3] sm:$0x1] %v265_v17 }
 0x1d4   :  { %278 = dma.vmem_to_hbm [thread:$0]  %s274_s27, 16, %s276_s30, [#allocation4]  }
 0x1d5   :  { %336 = dma.done.wait [#allocation4], 16  }
 0x1d6   :  { %337 = vsyncadd [#allocation4], 4294967280 }
 0x1d7   :  { %283 = vsyncpa [#allocation4], 1 }

</bundles_post_ra>
